<compile_context>
chip_gen: v7x
topology: tpu7x:2x2x1
jax: 0.10.0
libtpu: 0.0.40
codegen_flags: <defaults>
</compile_context>

<pallas_src>
import functools

import jax
import jax.numpy as jnp
from jax.experimental import pallas as pl
from jax.experimental.pallas import tpu as pltpu


def _round_up(a, m):
    return -(-a // m) * m


def _model_interface_kernel(x_ref, wconv_ref, bconv_ref, wout_ref, bout_ref,
                            o_ref, *, kernel_size, token_tile):
    # x_ref:     (Bblk, L_pad, H)              f32, resident across the token axis
    # wconv_ref: (K, H, H)                     bf16 conv taps
    # bconv_ref: (1, H)                        f32 conv bias
    # wout_ref:  (H, OUT_PAD)                  bf16 output projection (lane-padded)
    # bout_ref:  (1, OUT_PAD)                  f32 output bias (lane-padded)
    # o_ref:     (Bblk, token_tile, OUT_PAD)   bf16
    bb, _, h = x_ref.shape
    tl = token_tile
    k = kernel_size

    # Token offset of this tile inside the resident x block.
    t0 = pl.multiple_of(pl.program_id(1) * tl, tl)

    # Load the halo'd window once (f32 DMA'd block) and cast in-register to bf16.
    x_win = x_ref[:, pl.ds(t0, tl + k - 1), :].astype(jnp.bfloat16)

    # Conv = K accumulating MXU matmuls over shifted views (no im2col slab).
    acc = jnp.zeros((bb * tl, h), jnp.float32)
    for kk in range(k):
        xk = x_win[:, kk:kk + tl, :].reshape(bb * tl, h)
        acc = acc + jnp.dot(xk, wconv_ref[kk],
                            preferred_element_type=jnp.float32)

    acc = jnp.maximum(acc + bconv_ref[...], 0.0)          # conv bias + ReLU (f32)

    out = jnp.dot(acc.astype(jnp.bfloat16), wout_ref[...],
                  preferred_element_type=jnp.float32) + bout_ref[...]

    o_ref[...] = out.reshape(bb, tl, -1).astype(o_ref.dtype)


def model_interface_forward(x, w_conv, b_conv, w_out, b_out, *,
                            kernel_size, stride,
                            batch_block=None, token_tile=None):
    """x: [B, L, H] float32 -> [B, L_out, out_dim] float32 (stride must be 1)."""
    assert stride == 1, "example kernel implements stride=1 conv"
    b, l, h = x.shape
    k = kernel_size
    l_out = (l - k) // stride + 1
    out_dim = w_out.shape[-1]

    # ---- tile selection -------------------------------------------------
    if batch_block is None:
        batch_block = 1                       # deep grid, small per-step x block
    assert b % batch_block == 0
    n_bb = b // batch_block

    if token_tile is None:
        l_out_16 = _round_up(l_out, 16)
        token_tile = 16
        for cand in (128, 64, 32, 16):        # bf16-friendly sublane multiples
            if cand <= l_out_16:
                token_tile = cand
                break
        # Shrink until the grid is deep enough to pipeline / feed both v7x cores.
        while token_tile > 16 and n_bb * (-(-l_out_16 // token_tile)) < 8:
            token_tile //= 2
    assert token_tile % 16 == 0

    l_out_pad = _round_up(l_out, token_tile)
    n_tok = l_out_pad // token_tile
    l_pad = l_out_pad + k - 1

    out_pad = _round_up(out_dim, 128)         # lane-dense, unmasked stores

    # ---- wrapper-side layout plumbing (x stays f32; weights are tiny) ----
    if l_pad > l:
        x = jnp.pad(x, ((0, 0), (0, l_pad - l), (0, 0)))   # zero token padding

    w_conv_bf = w_conv.astype(jnp.bfloat16)                          # (K, H, H)
    b_conv_f = b_conv.reshape(1, h).astype(jnp.float32)
    w_out_bf = jnp.pad(w_out, ((0, 0), (0, out_pad - out_dim))).astype(jnp.bfloat16)
    b_out_f = jnp.pad(b_out.reshape(1, out_dim),
                      ((0, 0), (0, out_pad - out_dim))).astype(jnp.float32)

    # ---- VMEM budget (generation-aware: cap at v7x's 64 MiB physical) ----
    bytes_x_blk = batch_block * l_pad * h * 4
    bytes_out_blk = batch_block * token_tile * out_pad * 2
    bytes_wts = k * h * h * 2 + h * 4 + h * out_pad * 2 + out_pad * 4
    bytes_work = (batch_block * (token_tile + k - 1) * h * 2   # bf16 window
                  + batch_block * token_tile * h * 4           # f32 acc
                  + batch_block * token_tile * h * 2           # bf16 acc
                  + batch_block * token_tile * out_pad * 4)    # f32 out
    vmem_est = 2 * (bytes_x_blk + bytes_out_blk + bytes_wts) + bytes_work
    vmem_limit = int(min(64 * 2 ** 20, max(16 * 2 ** 20, 2 * vmem_est)))

    cost = pl.CostEstimate(
        flops=2 * b * l_out_pad * (k * h * h + h * out_pad),
        transcendentals=0,
        bytes_accessed=(b * l_pad * h * 4                   # x (f32 in)
                        + k * h * h * 2 + h * out_pad * 2   # weights (bf16)
                        + (h + out_pad) * 4                 # biases (f32)
                        + b * l_out_pad * out_pad * 2))     # out (bf16)

    kernel = functools.partial(_model_interface_kernel,
                               kernel_size=k, token_tile=token_tile)

    out = pl.pallas_call(
        kernel,
        out_shape=jax.ShapeDtypeStruct((b, l_out_pad, out_pad), jnp.bfloat16),
        grid=(n_bb, n_tok),
        in_specs=[
            pl.BlockSpec((batch_block, l_pad, h), lambda i, j: (i, 0, 0)),  # x
            pl.BlockSpec((k, h, h), lambda i, j: (0, 0, 0)),                # conv W
            pl.BlockSpec((1, h), lambda i, j: (0, 0)),                      # conv b
            pl.BlockSpec((h, out_pad), lambda i, j: (0, 0)),                # out W
            pl.BlockSpec((1, out_pad), lambda i, j: (0, 0)),                # out b
        ],
        out_specs=pl.BlockSpec((batch_block, token_tile, out_pad),
                               lambda i, j: (i, j, 0)),
        compiler_params=pltpu.CompilerParams(
            dimension_semantics=("parallel", "parallel"),
            vmem_limit_bytes=vmem_limit),
        cost_estimate=cost,
    )(x, w_conv_bf, b_conv_f, w_out_bf, b_out_f)

    # Strip the token/lane padding and return f32 for the caller.
    return out[:, :l_out, :out_dim].astype(jnp.float32)


def reference_forward(x, w_conv, b_conv, w_out, b_out, *, kernel_size, stride):
    """Pure-JAX reference mirroring the kernel's bf16 operand / output casts."""
    xb = x.astype(jnp.bfloat16).astype(jnp.float32)
    wcb = w_conv.astype(jnp.bfloat16).astype(jnp.float32)
    wob = w_out.astype(jnp.bfloat16).astype(jnp.float32)
    b, l, h = x.shape
    l_out = (l - kernel_size) // stride + 1
    acc = jnp.zeros((b, l_out, h), jnp.float32)
    for k in range(kernel_size):
        acc = acc + jnp.einsum("bld,de->ble", xb[:, k:k + l_out, :], wcb[k])
    acc = jnp.maximum(acc + b_conv.reshape(1, 1, h), 0.0)
    accb = acc.astype(jnp.bfloat16).astype(jnp.float32)
    out = jnp.einsum("bld,de->ble", accb, wob) + b_out.reshape(1, 1, -1)
    return out.astype(jnp.bfloat16).astype(jnp.float32)


if __name__ == "__main__":
    # Small shapes implied by the constructor args (token_len chosen so the
    # grid has several token tiles to pipeline even at batch=2).
    batch = 2
    token_len = 64
    hidden_dim = 32
    out_dim = 8
    kernel_size = 3
    stride = 1

    key = jax.random.PRNGKey(0)
    kx, kwc, kbc, kwo, kbo = jax.random.split(key, 5)

    x = jax.random.normal(kx, (batch, token_len, hidden_dim), jnp.float32)
    # Deterministic synthetic parameters (no checkpoint load; load_bert=False).
    w_conv = 0.1 * jax.random.normal(
        kwc, (kernel_size, hidden_dim, hidden_dim), jnp.float32)
    b_conv = 0.1 * jax.random.normal(kbc, (1, hidden_dim), jnp.float32)
    w_out = 0.1 * jax.random.normal(kwo, (hidden_dim, out_dim), jnp.float32)
    b_out = 0.1 * jax.random.normal(kbo, (1, out_dim), jnp.float32)

    out = model_interface_forward(x, w_conv, b_conv, w_out, b_out,
                                  kernel_size=kernel_size, stride=stride)
    out = jax.block_until_ready(out)

    ref = reference_forward(x, w_conv, b_conv, w_out, b_out,
                            kernel_size=kernel_size, stride=stride)
    l_out = (token_len - kernel_size) // stride + 1
    assert out.shape == (batch, l_out, out_dim)
    assert jnp.allclose(out, ref, atol=2e-2, rtol=2e-2), \
        float(jnp.max(jnp.abs(out - ref)))

    print("KERNEL_OK")
</pallas_src>

<mosaic_0001>
module attributes {stable_mosaic.version = 11 : i64} {
  func.func @_model_interface_kernel(%arg0: i32, %arg1: i32, %arg2: memref<1x66x32xf32, #tpu.memory_space<vmem>>, %arg3: memref<3x32x32xbf16, #tpu.memory_space<vmem>>, %arg4: memref<1x32xf32, #tpu.memory_space<vmem>>, %arg5: memref<32x128xbf16, #tpu.memory_space<vmem>>, %arg6: memref<1x128xf32, #tpu.memory_space<vmem>>, %arg7: memref<1x16x128xbf16, #tpu.memory_space<vmem>>) attributes {dimension_semantics = [#tpu.dimension_semantics<parallel>, #tpu.dimension_semantics<parallel>], iteration_bounds = array<i64: 2, 4>, scalar_prefetch = 0 : i64, scratch_operands = 0 : i64, tpu.core_type = #tpu.core_type<tc>, window_params = [{transform_indices = @transform_0, window_bounds = array<i64: 1, 66, 32>}, {pipeline_mode = #tpu.pipeline_mode<synchronous>, transform_indices = @transform_1, window_bounds = array<i64: 3, 32, 32>}, {pipeline_mode = #tpu.pipeline_mode<synchronous>, transform_indices = @transform_2, window_bounds = array<i64: 1, 32>}, {pipeline_mode = #tpu.pipeline_mode<synchronous>, transform_indices = @transform_3, window_bounds = array<i64: 32, 128>}, {pipeline_mode = #tpu.pipeline_mode<synchronous>, transform_indices = @transform_4, window_bounds = array<i64: 1, 128>}, {transform_indices = @transform_5, window_bounds = array<i64: 1, 16, 128>}]} {
    %c16_i32 = arith.constant 16 : i32
    %0 = arith.muli %arg1, %c16_i32 : i32
    %1 = tpu.assume_multiple %0, 16 : i32
    %c0 = arith.constant 0 : index
    %2 = arith.index_cast %1 : i32 to index
    %c0_0 = arith.constant 0 : index
    %3 = vector.load %arg2[%c0, %2, %c0_0] : memref<1x66x32xf32, #tpu.memory_space<vmem>>, vector<1x18x32xf32>
    %4 = arith.truncf %3 : vector<1x18x32xf32> to vector<1x18x32xbf16>
    %cst = arith.constant 0.000000e+00 : f32
    %5 = vector.broadcast %cst : f32 to vector<16x32xf32>
    %6 = vector.extract_strided_slice %4 {offsets = [0, 0, 0], sizes = [1, 16, 32], strides = [1, 1, 1]} : vector<1x18x32xbf16> to vector<1x16x32xbf16>
    %7 = vector.shape_cast %6 : vector<1x16x32xbf16> to vector<16x32xbf16>
    %c0_1 = arith.constant 0 : index
    %c0_2 = arith.constant 0 : index
    %c0_3 = arith.constant 0 : index
    %8 = vector.load %arg3[%c0_1, %c0_2, %c0_3] : memref<3x32x32xbf16, #tpu.memory_space<vmem>>, vector<1x32x32xbf16>
    %9 = vector.shape_cast %8 : vector<1x32x32xbf16> to vector<32x32xbf16>
    %cst_4 = arith.constant dense<0.000000e+00> : vector<16x32xf32>
    %10 = tpu.matmul %7, %9, %cst_4 {dimension_numbers = #tpu.dot_dimension_numbers<[1], [0], [0], [1], [0, 0, 1, 1], [], []>} : vector<16x32xbf16>, vector<32x32xbf16>, vector<16x32xf32> -> vector<16x32xf32>
    %11 = arith.addf %5, %10 : vector<16x32xf32>
    %12 = vector.extract_strided_slice %4 {offsets = [0, 1, 0], sizes = [1, 16, 32], strides = [1, 1, 1]} : vector<1x18x32xbf16> to vector<1x16x32xbf16>
    %13 = vector.shape_cast %12 : vector<1x16x32xbf16> to vector<16x32xbf16>
    %c1 = arith.constant 1 : index
    %c0_5 = arith.constant 0 : index
    %c0_6 = arith.constant 0 : index
    %14 = vector.load %arg3[%c1, %c0_5, %c0_6] : memref<3x32x32xbf16, #tpu.memory_space<vmem>>, vector<1x32x32xbf16>
    %15 = vector.shape_cast %14 : vector<1x32x32xbf16> to vector<32x32xbf16>
    %cst_7 = arith.constant dense<0.000000e+00> : vector<16x32xf32>
    %16 = tpu.matmul %13, %15, %cst_7 {dimension_numbers = #tpu.dot_dimension_numbers<[1], [0], [0], [1], [0, 0, 1, 1], [], []>} : vector<16x32xbf16>, vector<32x32xbf16>, vector<16x32xf32> -> vector<16x32xf32>
    %17 = arith.addf %11, %16 : vector<16x32xf32>
    %18 = vector.extract_strided_slice %4 {offsets = [0, 2, 0], sizes = [1, 16, 32], strides = [1, 1, 1]} : vector<1x18x32xbf16> to vector<1x16x32xbf16>
    %19 = vector.shape_cast %18 : vector<1x16x32xbf16> to vector<16x32xbf16>
    %c2 = arith.constant 2 : index
    %c0_8 = arith.constant 0 : index
    %c0_9 = arith.constant 0 : index
    %20 = vector.load %arg3[%c2, %c0_8, %c0_9] : memref<3x32x32xbf16, #tpu.memory_space<vmem>>, vector<1x32x32xbf16>
    %21 = vector.shape_cast %20 : vector<1x32x32xbf16> to vector<32x32xbf16>
    %cst_10 = arith.constant dense<0.000000e+00> : vector<16x32xf32>
    %22 = tpu.matmul %19, %21, %cst_10 {dimension_numbers = #tpu.dot_dimension_numbers<[1], [0], [0], [1], [0, 0, 1, 1], [], []>} : vector<16x32xbf16>, vector<32x32xbf16>, vector<16x32xf32> -> vector<16x32xf32>
    %23 = arith.addf %17, %22 : vector<16x32xf32>
    %c0_11 = arith.constant 0 : index
    %c0_12 = arith.constant 0 : index
    %24 = vector.load %arg4[%c0_11, %c0_12] : memref<1x32xf32, #tpu.memory_space<vmem>>, vector<1x32xf32>
    %25 = vector.broadcast %24 : vector<1x32xf32> to vector<16x32xf32>
    %26 = arith.addf %23, %25 : vector<16x32xf32>
    %cst_13 = arith.constant 0.000000e+00 : f32
    %27 = vector.broadcast %cst_13 : f32 to vector<16x32xf32>
    %28 = arith.maximumf %26, %27 : vector<16x32xf32>
    %29 = arith.truncf %28 : vector<16x32xf32> to vector<16x32xbf16>
    %c0_14 = arith.constant 0 : index
    %c0_15 = arith.constant 0 : index
    %30 = vector.load %arg5[%c0_14, %c0_15] : memref<32x128xbf16, #tpu.memory_space<vmem>>, vector<32x128xbf16>
    %cst_16 = arith.constant dense<0.000000e+00> : vector<16x128xf32>
    %31 = tpu.matmul %29, %30, %cst_16 {dimension_numbers = #tpu.dot_dimension_numbers<[1], [0], [0], [1], [0, 0, 1, 1], [], []>} : vector<16x32xbf16>, vector<32x128xbf16>, vector<16x128xf32> -> vector<16x128xf32>
    %c0_17 = arith.constant 0 : index
    %c0_18 = arith.constant 0 : index
    %32 = vector.load %arg6[%c0_17, %c0_18] : memref<1x128xf32, #tpu.memory_space<vmem>>, vector<1x128xf32>
    %33 = vector.broadcast %32 : vector<1x128xf32> to vector<16x128xf32>
    %34 = arith.addf %31, %33 : vector<16x128xf32>
    %35 = vector.shape_cast %34 : vector<16x128xf32> to vector<1x16x128xf32>
    %36 = arith.truncf %35 : vector<1x16x128xf32> to vector<1x16x128xbf16>
    %c0_19 = arith.constant 0 : index
    %c0_20 = arith.constant 0 : index
    %c0_21 = arith.constant 0 : index
    %37 = vector.load %arg7[%c0_19, %c0_20, %c0_21] : memref<1x16x128xbf16, #tpu.memory_space<vmem>>, vector<1x16x128xbf16>
    tpu.vector_store %arg7[%c0_19, %c0_20, %c0_21], %36 {strides = array<i32>} : memref<1x16x128xbf16, #tpu.memory_space<vmem>>, vector<1x16x128xbf16>,
    return
  }
  func.func @transform_0(%arg0: i32, %arg1: i32) -> (i32, i32, i32) {
    %c0_i32 = arith.constant 0 : i32
    %c0_i32_0 = arith.constant 0 : i32
    %c0_i32_1 = arith.constant 0 : i32
    return %arg0, %c0_i32, %c0_i32_0 : i32, i32, i32
  }
  func.func @transform_1(%arg0: i32, %arg1: i32) -> (i32, i32, i32) {
    %c0_i32 = arith.constant 0 : i32
    %c0_i32_0 = arith.constant 0 : i32
    %c0_i32_1 = arith.constant 0 : i32
    %c0_i32_2 = arith.constant 0 : i32
    return %c0_i32, %c0_i32_0, %c0_i32_1 : i32, i32, i32
  }
  func.func @transform_2(%arg0: i32, %arg1: i32) -> (i32, i32) {
    %c0_i32 = arith.constant 0 : i32
    %c0_i32_0 = arith.constant 0 : i32
    %c0_i32_1 = arith.constant 0 : i32
    return %c0_i32, %c0_i32_0 : i32, i32
  }
  func.func @transform_3(%arg0: i32, %arg1: i32) -> (i32, i32) {
    %c0_i32 = arith.constant 0 : i32
    %c0_i32_0 = arith.constant 0 : i32
    %c0_i32_1 = arith.constant 0 : i32
    return %c0_i32, %c0_i32_0 : i32, i32
  }
  func.func @transform_4(%arg0: i32, %arg1: i32) -> (i32, i32) {
    %c0_i32 = arith.constant 0 : i32
    %c0_i32_0 = arith.constant 0 : i32
    %c0_i32_1 = arith.constant 0 : i32
    return %c0_i32, %c0_i32_0 : i32, i32
  }
  func.func @transform_5(%arg0: i32, %arg1: i32) -> (i32, i32, i32) {
    %c0_i32 = arith.constant 0 : i32
    %c0_i32_0 = arith.constant 0 : i32
    return %arg0, %arg1, %c0_i32 : i32, i32, i32
  }
}

</mosaic_0001>

<bundles_post_ra>
// kernel: tpu_custom_call.1
= control target key start
LH: loop header
LB: loop body
LE: loop exit
PB: predicated region body
PF: predicated region fallthrough
CT: control target
= control target key end

     0   :  { %10 = vsyncpa [#allocation3], 0  ;;  %s1113_s0 = inlined_call_operand.vmem [shape: f32[2,66,32], index: 0, kind: input, shape index: {}]   ;;  %s1114_s1 = inlined_call_operand.vmem [shape: bf16[3,32,32], index: 1, kind: input, shape index: {}]   ;;  %s1115_s2 = inlined_call_operand.vmem [shape: f32[1,32], index: 2, kind: input, shape index: {}]   ;;  %s1116_s3 = inlined_call_operand.vmem [shape: bf16[32,128], index: 3, kind: input, shape index: {}]   ;;  %s1117_s4 = inlined_call_operand.vmem [shape: f32[1,128], index: 4, kind: input, shape index: {}]   ;;  %s1118_s5 = inlined_call_operand.hbm [shape: bf16[2,64,128], index: 5, kind: output, shape index: {}]  }
   0x1   :  { %12 = vsyncpa [#allocation3 + $0x1], 0  ;;  %s936_s18 = smov 0   ;;  %s938_s19 = smov 0  }
   0x2   :  { %s940_s20 = smov 0   ;;  %s942_s21 = smov 0  }
   0x3   :  { %s944_s22 = smov 0   ;;  %s946_s23 = smov 0  }
   0x4   :  { %s948_s24 = smov 0   ;;  %s950_s25 = smov 0  }
   0x5 LB: > { %s632_s26 = sadd.s32 4294967295, %s899_s25   ;;  %s633_s27 = sadd.s32 4294967294, %s899_s25   ;;  %s899_s25 = sphi %s950_s25, %s18_s25   ;;  %s895_s24 = sphi %s948_s24, %s1127_s24   ;;  %s891_s23 = sphi %s946_s23, %s1126_s23   ;;  %s887_s22 = sphi %s944_s22, %s1125_s22   ;;  %s883_s21 = sphi %s942_s21, %s1124_s21   ;;  %s879_s20 = sphi %s940_s20, %s1123_s20   ;;  %s875_s19 = sphi %s938_s19, %s1122_s19   ;;  %s871_s18 = sphi %s936_s18, %s1121_s18  }
   0x6   : > { %s27_s28 = sadd.s32 1, %s891_s23  ;;  %s30_s29 = sadd.s32 1, %s895_s24 }
   0x7   : > { %p28_p0 = scmp.ge.s32.totalorder %s27_s28, 4  ;;  %p159_p1 = scmp.ne.s32.totalorder %s879_s20, %s875_s19 }
   0x8   : > { %p160_p2 = scmp.eq.s32.totalorder %s632_s26, 7  ;;  %p165_p5 = scmp.ne.s32.totalorder %s875_s19, %s871_s18 }
   0x9   : > { %s1129_s28 = smov (%p28_p0, %s27_s28), 0  ;;  %s1131_s29 = smov (!%p28_p0, %s30_s29), %s895_s24 }
   0xa   : > { %s145_s30 = ssub.s32 %s891_s23, %s1129_s28  ;;  %p987_p3 = por %p160_p2, %p159_p1 }
   0xb   : > { %p32_p4 = scmp.ge.s32.totalorder %s1131_s29, 2  ;;  %p166_p6 = scmp.eq.s32.totalorder %s633_s27, 7 }
   0xc   : > { %p636_p7 = scmp.ge.s32.totalorder %s899_s25, 1  ;;  %p204_p9 = scmp.lt.s32.totalorder %s899_s25, 9 }
   0xd   : > { %s1133_s29 = smov (%p32_p4, %s1131_s29), 0  ;;  %p996_p8 = por %p166_p6, %p165_p5 }
   0xe   : > { %s144_s8 = ssub.s32 %s895_s24, %s1133_s29  ;;  %s149_s9 = sadd.s32 1, %s879_s20 }
   0xf   : > { %s146_s10 = sor.u32 %s145_s30, %s144_s8  ;;  %p205_p10 = pnand %p636_p7, %p204_p9 }
  0x10   : > { %p147_p11 = scmp.eq.s32.totalorder %s146_s10, 0  ;;  %v797_v0 = vld [vmem:[%s1114_s1 + $0x10] sm:$0xff] (!%p205_p10)   ;;  %v901_v1 = vmov (!%p205_p10), 0.0   ;;  %v798_v2 = vld [vmem:[%s1114_s1] sm:$0xff] (!%p205_p10)   ;;  %v799_v3 = vld [vmem:[%s1114_s1 + $0x18] sm:$0xff] (!%p205_p10)   ;;  %vm902_vm0 = vmmov (!%p205_p10), 0  }
  0x11   : > { %208 = sbr.rel (%p205_p10) target bundleno = 503 (0x1f7), region = 40  ;;  %689 = vmatprep.subr.bf16.mxu0 (!%p205_p10), %v901_v1  ;;  %697 = vmatprep.subr.bf16.mxu1 (!%p205_p10), %v901_v1  ;;  %p232_p12 = scmp.lt.s32.totalorder (!%p205_p10), %s887_s22, 1  ;;  %v800_v4 = vld [vmem:[%s1114_s1 + $0x8] sm:$0xff] (!%p205_p10)   ;;  %vm280_vm1 = vcmask (!%p205_p10), 261120   ;;  %vm255_vm2 = vsmask.f32 (!%p205_p10), 7424 }
  0x12   : > { %s1005_s11 = scalar_select %p147_p11, %s879_s20, %s149_s9  }
  0x13   : > { %690 = vmatpush3.bf16.msra.mxu0 (!%p205_p10), %v797_v0  ;;  %693 = vmatprep.mubr.msk.bf16.mxu0 (!%p205_p10), %vm902_vm0, %v901_v1  ;;  %s639_s9 = sshll.u32 (!%p205_p10), %s883_s21, 4  ;;  %v801_v16 = vld [vmem:[%s1114_s1 + $0x20] sm:$0xff] (!%p205_p10)   ;;  %v802_v18 = vld [vmem:[%s1114_s1 + $0x28] sm:$0xff] (!%p205_p10)   ;;  %vm387_vm3 = vcmask (!%p205_p10), 1046528   ;;  %s665_s15 = sshll.u32 (!%p205_p10), %s883_s21, 1 }
  0x14   : > { %698 = vmatpush3.bf16.msra.mxu1 (!%p205_p10), %v798_v2  ;;  %691 = vmatprep.subr.bf16.mxu0 (!%p205_p10), %v901_v1  ;;  %v803_v22 = vld [vmem:[%s1116_s3] sm:$0xff] (!%p205_p10)   ;;  %v804_v23 = vld [vmem:[%s1116_s3 + $0x8] sm:$0xff] (!%p205_p10)   ;;  %s666_s16 = sshll.u32 (!%p205_p10), %s887_s22, 3 }
  0x15   : > { %699 = vmatprep.subr.bf16.mxu1 (!%p205_p10), %v901_v1  ;;  %701 = vmatprep.mubr.msk.bf16.mxu1 (!%p205_p10), %vm902_vm0, %v901_v1  ;;  %v657_v35 = vld [vmem:[%s1115_s2] ss:$0 sm:$0xff] (!%p205_p10)  ;;  %s551_s17 = sadd.s32 (!%p205_p10), %s666_s16, %s665_s15  ;;  %s903_s15 = smov (!%p205_p10), [#allocation2]  }
  0x16   : > { %v658_v46 = vld [vmem:[%s1117_s4] ss:$0 sm:$0xff] (!%p205_p10)  ;;  %s809_s16 = sshll.u32 (!%p205_p10), %s903_s15, 4  ;;  %s810_s16 = int_to_ptr.vmem [resolvable:$false] %s809_s16 }
  0x17   : > { %692 = vmatpush3.bf16.msra.mxu0 (!%p205_p10), %v799_v3 }
  0x18   : > { %s233_s30 = scalar_select %p232_p12, %s887_s22, 1  ;;  %700 = vmatpush3.bf16.msra.mxu1 %v800_v4  ;;  %705 = vmatprep.subr.bf16.mxu0 %v901_v1 }
  0x19   : > { %713 = vmatprep.subr.bf16.mxu1 %v901_v1 }
  0x1a   : > { %s721_s8 = smul.u32 72, %s233_s30 }
  0x1c   : > { %s236_s13 = scalar_lea.vmem %s1113_s0, %s721_s8 }
  0x1d   : > { %s240_s14 = scalar_lea.vmem %s236_s13, %s639_s9  ;;  %s229_s13 = sand.u32 1, %s875_s19  }
  0x1e   : > { %v241_v5 = vld [vmem:[%s240_s14] sm:$0xff]  ;;  %v242_v6 = vld [vmem:[%s240_s14 + $0x8] sm:$0xff]  ;;  %v243_v7 = vld [vmem:[%s240_s14 + $0x10] sm:$0x3]  ;;  %s637_s14 = sshll.u32 %s229_s13, 3  ;;  %s667_s9 = sshll.u32 %s551_s17, 6 }
  0x1f   : > { %v244_v8 = vpack.c.bf16 %v242_v6, %v241_v5  ;;  %v245_v9 = vpack.c.bf16 %v243_v7, %v243_v7  ;;  %s231_s30 = scalar_lea.vmem [#allocation2], %s637_s14  ;;  %s1059_s22 = scalar_lea.hbm %s1118_s5, %s667_s9 }
  0x20   : > { %s554_s8 = sshll.u32 %s231_s30, 4  ;;  %s1061_s12 = scalar_lea.sflag [#allocation3], %s229_s13  ;;  %s1054_s8 = int_to_ptr.vmem [resolvable:$true] %s554_s8 }
  0x21   : > { %v257_v10 = vshrl.u32 %v244_v8, 16  ;;  %v259_v11 = vshll.u32 %v244_v8, 16  ;;  %v264_v12 = vshll.u32 %v245_v9, 16  ;;  %702 = vmatmul.mubr.msk.bf16.vlgmr.msra.gmra.mrb[0].mxu1 %vm280_vm1, %v244_v8  ;;  %v388_v19 = vrot.slane %v244_v8, 1  ;;  %s805_s14 = scalar_lea.vmem %s1054_s8, 128  ;;  %s811_s17 = scalar_lea.vmem %s810_s16, 256 }
  0x22   : > { %717 = vmatprep.mubr.msk.bf16.mxu1 %vm902_vm0, %v901_v1  ;;  %v389_v20 = vrot.slane %v245_v9, 1  ;;  %714 = vmatpush3.bf16.msra.mxu1 %v803_v22  ;;  %p806_p13 = scmp.ne.s32.totalorder %s1054_s8, %s805_s14  ;;  %p812_p2 = scmp.lt.s32.totalorder %s1054_s8, %s810_s16 }
  0x23   : > { %v261_v13 = vrot.slane %v259_v11, 1  ;;  %v266_v14 = vrot.slane %v264_v12, 1  ;;  %715 = vmatprep.subr.bf16.mxu1 %v901_v1  ;;  %p813_p4 = scmp.lt.s32.totalorder %s811_s17, %s805_s14 }
  0x24   : > { %v390_v21 = vsel %vm387_vm3, %v388_v19, %v389_v20  ;;  %p807_p0 = pnand %p806_p13, %p987_p3 }
  0x25   : > { %v262_v15 = vor.u32 %v261_v13, %v257_v10  ;;  %p814_p5 = por %p813_p4, %p812_p2 }
  0x26   : > { %716 = vmatpush3.bf16.msra.mxu1 %v804_v23  ;;  %p808_p1 = pneg %p807_p0 }
  0x27   : > { %v267_v17 = vsel %vm255_vm2, %v262_v15, %v266_v14 }
  0x28   : > { %694 = vmatmul.mubr.msk.bf16.vlgmr.msra.gmra.mrb[0].mxu0 %vm280_vm1, %v267_v17  ;;  %p815_p6 = pnand %p814_p5, %p808_p1 }
  0x29   : > { %706 = vmatpush3.bf16.msra.mxu0 %v801_v16  ;;  %709 = vmatprep.mubr.msk.bf16.mxu0 %vm902_vm0, %v901_v1 }
  0x2a   : > { %707 = vmatprep.subr.bf16.mxu0 %v901_v1 }
  0x2d   : > { %708 = vmatpush3.bf16.msra.mxu0 %v802_v18 }
  0x30   : > { %710 = vmatmul.mubr.msk.bf16.vlgmr.msra.gmra.mrb[4].mxu0 %vm280_vm1, %v390_v21 }
  0xf4   : > { %v373_v24 = vpop.f32.mrb[0].mxu1 }
  0xf5   : > { %v703_v25 = vpop.f32.mrb[1].mxu1 }
  0xf6   : > { %v376_v26 = vpop.f32.mrb[2].mxu1 }
  0xf7   : > { %v704_v27 = vpop.f32.mrb[3].mxu1 }
  0xfb   : > { %v318_v28 = vpop.f32.mrb[0].mxu0 }
  0xfc   : > { %v374_v29 = vadd.f32 %v373_v24, %v318_v28  ;;  %v695_v30 = vpop.f32.mrb[1].mxu0 }
  0xfd   : > { %v321_v31 = vpop.f32.mrb[2].mxu0 }
  0xfe   : > { %v377_v32 = vadd.f32 %v376_v26, %v321_v31  ;;  %v696_v33 = vpop.f32.mrb[3].mxu0 }
 0x103   : > { %v440_v34 = vpop.f32.mrb[4].mxu0 }
 0x104   : > { %v447_v36 = vadd.f32 %v440_v34, %v374_v29  ;;  %v711_v37 = vpop.f32.mrb[5].mxu0 }
 0x105   : > { %v443_v38 = vpop.f32.mrb[6].mxu0 }
 0x106   : > { %v456_v39 = vadd.f32 %v657_v35, %v447_v36  ;;  %v448_v40 = vadd.f32 %v443_v38, %v377_v32  ;;  %v712_v41 = vpop.f32.mrb[7].mxu0 }
 0x108   : > { %v457_v42 = vadd.f32 %v657_v35, %v448_v40  ;;  %v458_v43 = vmax.f32 %v456_v39, 0.0 }
 0x10a   : > { %v459_v44 = vmax.f32 %v457_v42, 0.0 }
 0x10c   : > { %v460_v45 = vpack.c.bf16 %v459_v44, %v458_v43 }
 0x10e   : > { %718 = vmatmul.mubr.msk.bf16.vlgmr.msra.gmra.mrb[4].mxu1 %vm280_vm1, %v460_v45 }
 0x1e1   : > { %v521_v47 = vpop.f32.mrb[4].mxu1 }
 0x1e2   : > { %v719_v48 = vpop.f32.mrb[5].mxu1  ;;  %v522_v50 = vadd.f32 %v658_v46, %v521_v47 }
 0x1e3   : > { %v524_v49 = vpop.f32.mrb[6].mxu1 }
 0x1e4   : > { %v525_v51 = vadd.f32 %v658_v46, %v524_v49  ;;  %v720_v52 = vpop.f32.mrb[7].mxu1 }
 0x1e6   : > { %v675_v53 = vpack.c.bf16 %v525_v51, %v522_v50 }
 0x1e8   : > { %676 = vst [vmem:[%s231_s30] sm:$0xff] %v675_v53  }
 0x1e9   : > { %818 = shalt.err (!%p815_p6)
}
 0x1ea   : > { %s819_s13 = scalar_lea.hbm %s1059_s22, 128  ;;  %s823_s30 = scalar_lea.hbm %s1118_s5, 1024 }
 0x1eb   : > { %p820_p7 = scmp.ne.s32.totalorder %s1059_s22, %s819_s13  ;;  %p824_p11 = scmp.lt.u32.totalorder %s1059_s22, %s1118_s5 }
 0x1ec   : > { %p825_p12 = scmp.lt.u32.totalorder %s823_s30, %s819_s13  ;;  %p827_p0 = scmp.lt.u32.totalorder %s819_s13, %s1059_s22 }
 0x1ed   : > { %p821_p9 = pnand %p820_p7, %p987_p3 }
 0x1ee   : > { %p826_p13 = por %p825_p12, %p824_p11 }
 0x1ef   : > { %p822_p10 = pneg %p821_p9 }
 0x1f0   : > { %p828_p1 = por %p827_p0, %p826_p13 }
 0x1f2   : > { %p829_p2 = pnand %p828_p1, %p822_p10 }
 0x1f4   : > { %832 = shalt.err (!%p829_p2)
}
 0x1f5   : > { %s904_s21 = smov 64   ;;  %s905_s14 = smov 4  }
 0x1f6   : > { %722 = dma.vmem_to_hbm [thread:$0]  (%p987_p3), %s1054_s8, 128, %s1059_s22, %s1061_s12, %s904_s21, %s904_s21, %s905_s14  }
 0x1f7 PF: > { %p728_p4 = scmp.ge.s32.totalorder %s899_s25, 2  ;;  %s569_s15 = sand.u32 1, %s871_s18  }
 0x1f8   : > { %s570_s16 = scalar_lea.sflag [#allocation3], %s569_s15 }
 0x1f9   : > { %p725_p5 = pnand %p728_p4, %p996_p8 }
 0x1fb   : > { %866 = dma.done.wait (!%p725_p5), %s570_s16, 128  }
 0x1fc   : > { %868 = vsyncadd (!%p725_p5), %s570_s16, 4294967168  ;;  %s18_s25 = sadd.s32 1, %s899_s25   ;;  %s1121_s18 = smov %s875_s19 }
 0x1fd   : > { %p15_p6 = scmp.ge.s32.totalorder %s18_s25, 10   ;;  %s1122_s19 = smov %s879_s20 }
 0x1fe   : > { %s1123_s20 = smov %s1005_s11  ;;  %s1124_s21 = smov %s891_s23 }
 0x1ff   : > { %s1125_s22 = smov %s895_s24  ;;  %s1126_s23 = smov %s1129_s28 }
 0x200   : > { %s1127_s24 = smov %s1133_s29  ;;  %17 = sbr.rel (!%p15_p6) target bundleno = 5 (0x5), region = 78 }
 0x207   :  { %575 = vsyncpa [#allocation3], 1 }
 0x208   :  { %577 = vsyncpa [#allocation3 + $0x1], 1 }

</bundles_post_ra>
